<compile_context>
chip_gen: v5e
topology: v5e:2x2
jax: 0.10.0
libtpu: 0.0.40
codegen_flags: <defaults>
</compile_context>

<pallas_src>
import functools
import math

import jax
import jax.numpy as jnp
from jax.experimental import pallas as pl
from jax.experimental.pallas import tpu as pltpu


def _build_pe_table(max_len: int, d_model: int) -> jnp.ndarray:
    """Deterministic sinusoidal table, identical to the PyTorch __init__.

    Returns shape (max_len, 1, d_model), float32.
    """
    assert d_model % 2 == 0, "sinusoidal PE requires an even d_model (same as the PyTorch original)"
    position = jnp.arange(0, max_len, dtype=jnp.float32)[:, None]            # (L, 1)
    div_term = jnp.exp(
        jnp.arange(0, d_model, 2, dtype=jnp.float32) * (-math.log(10000.0) / d_model)
    )                                                                         # (D//2,)
    angles = position * div_term                                              # (L, D//2)
    pe = jnp.zeros((max_len, d_model), dtype=jnp.float32)
    pe = pe.at[:, 0::2].set(jnp.sin(angles))
    pe = pe.at[:, 1::2].set(jnp.cos(angles))
    # unsqueeze(0).transpose(0, 1)  ->  (max_len, 1, d_model)
    return pe[:, None, :]


def _pe_add_kernel(x_ref, pe_ref, o_ref, *, batch: int):
    # x_ref: (ts, B*D)  pe_ref: (ts, D)  o_ref: (ts, B*D)
    x = x_ref[...]
    pe = pe_ref[...]
    # Replicate the (ts, D) positional rows across the batch groups along the
    # lane axis so pe_rep[s, b*D + d] == pe[s, d], matching x2[s, b*D + d].
    pe_rep = jnp.tile(pe, (1, batch))
    o_ref[...] = (x + pe_rep).astype(o_ref.dtype)


def _choose_seq_tile(seq_len: int, row_bytes: int, target_bytes: int = 2 * 1024 * 1024) -> int:
    """Pick the largest seq tile <= seq_len whose x-block is ~target_bytes.

    Keeps the double-buffered working set well under the v5e 16 MiB default
    scoped VMEM while being large enough to amortize per-grid-step overhead.
    """
    ts = max(1, target_bytes // max(row_bytes, 1))
    ts = min(ts, seq_len)
    if ts < seq_len:
        ts = max(8, (ts // 8) * 8)  # (8, 128) tiling: sublane dim multiple of 8
    return ts


def positional_encoding_forward(x: jnp.ndarray, pe: jnp.ndarray) -> jnp.ndarray:
    """x: (S, B, D); pe: (max_len, 1, D). Returns x + pe[:S] (broadcast over B)."""
    S, B, D = x.shape
    assert pe.shape[0] >= S and pe.shape[2] == D

    # Compact per-position table, cast to the activation dtype in the wrapper
    # so the in-kernel add/store involves no implicit promotion.
    pe_slice = pe[:S, 0, :].astype(x.dtype)          # (S, D)

    # Lane-dense 2D slab view of x (free reshape of a contiguous array).
    x2 = x.reshape(S, B * D)

    itemsize = jnp.dtype(x.dtype).itemsize
    ts = _choose_seq_tile(S, B * D * itemsize)
    grid = (pl.cdiv(S, ts),)

    out2 = pl.pallas_call(
        functools.partial(_pe_add_kernel, batch=B),
        out_shape=jax.ShapeDtypeStruct((S, B * D), x.dtype),
        grid=grid,
        in_specs=[
            pl.BlockSpec((ts, B * D), lambda i: (i, 0)),
            pl.BlockSpec((ts, D), lambda i: (i, 0)),
        ],
        out_specs=pl.BlockSpec((ts, B * D), lambda i: (i, 0)),
        compiler_params=pltpu.CompilerParams(
            dimension_semantics=("parallel",),
            vmem_limit_bytes=32 * 1024 * 1024,
        ),
    )(x2, pe_slice)

    return out2.reshape(S, B, D)


if __name__ == "__main__":
    d_model = 32
    max_len = 512
    seq_len = 8
    batch = 2

    key = jax.random.PRNGKey(0)
    x = jax.random.normal(key, (seq_len, batch, d_model), dtype=jnp.float32)

    pe = _build_pe_table(max_len, d_model)

    out = positional_encoding_forward(x, pe)
    out = jax.block_until_ready(out)

    # Reference check in plain JAX (same math as the PyTorch forward).
    ref = x + pe[:seq_len]
    assert out.shape == (seq_len, batch, d_model)
    assert jnp.allclose(out, ref, atol=1e-6, rtol=1e-6)

    print("KERNEL_OK")
</pallas_src>

<mosaic_0001>
module attributes {stable_mosaic.version = 11 : i64} {
  func.func @_pe_add_kernel(%arg0: i32, %arg1: memref<8x64xf32, #tpu.memory_space<vmem>>, %arg2: memref<8x32xf32, #tpu.memory_space<vmem>>, %arg3: memref<8x64xf32, #tpu.memory_space<vmem>>) attributes {dimension_semantics = [#tpu.dimension_semantics<parallel>], iteration_bounds = array<i64: 1>, scalar_prefetch = 0 : i64, scratch_operands = 0 : i64, tpu.core_type = #tpu.core_type<tc>, window_params = [{transform_indices = @transform_0, window_bounds = array<i64: 8, 64>}, {transform_indices = @transform_1, window_bounds = array<i64: 8, 32>}, {transform_indices = @transform_2, window_bounds = array<i64: 8, 64>}]} {
    %c0 = arith.constant 0 : index
    %c0_0 = arith.constant 0 : index
    %0 = vector.load %arg1[%c0, %c0_0] : memref<8x64xf32, #tpu.memory_space<vmem>>, vector<8x64xf32>
    %c0_1 = arith.constant 0 : index
    %c0_2 = arith.constant 0 : index
    %1 = vector.load %arg2[%c0_1, %c0_2] : memref<8x32xf32, #tpu.memory_space<vmem>>, vector<8x32xf32>
    %2 = tpu.concatenate %1, %1 in 1 : vector<8x32xf32>, vector<8x32xf32> -> vector<8x64xf32>
    %3 = arith.addf %0, %2 : vector<8x64xf32>
    %c0_3 = arith.constant 0 : index
    %c0_4 = arith.constant 0 : index
    %4 = vector.load %arg3[%c0_3, %c0_4] : memref<8x64xf32, #tpu.memory_space<vmem>>, vector<8x64xf32>
    tpu.vector_store %arg3[%c0_3, %c0_4], %3 {strides = array<i32>} : memref<8x64xf32, #tpu.memory_space<vmem>>, vector<8x64xf32>,
    return
  }
  func.func @transform_0(%arg0: i32) -> (i32, i32) {
    %c0_i32 = arith.constant 0 : i32
    %c0_i32_0 = arith.constant 0 : i32
    return %arg0, %c0_i32 : i32, i32
  }
  func.func @transform_1(%arg0: i32) -> (i32, i32) {
    %c0_i32 = arith.constant 0 : i32
    %c0_i32_0 = arith.constant 0 : i32
    return %arg0, %c0_i32 : i32, i32
  }
  func.func @transform_2(%arg0: i32) -> (i32, i32) {
    %c0_i32 = arith.constant 0 : i32
    %c0_i32_0 = arith.constant 0 : i32
    return %arg0, %c0_i32 : i32, i32
  }
}

</mosaic_0001>

<bundles_post_ra>
// kernel: tpu_custom_call.1
= control target key start
LH: loop header
LB: loop body
LE: loop exit
PB: predicated region body
PF: predicated region fallthrough
CT: control target
= control target key end

     0   :  { %7 = vsyncpa [#allocation3], 0  ;;  %s179_s0 = inlined_call_operand.hbm [shape: f32[8,64], index: 0, kind: input, shape index: {}]   ;;  %s180_s1 = inlined_call_operand.hbm [shape: f32[8,32], index: 1, kind: input, shape index: {}]   ;;  %s181_s2 = inlined_call_operand.hbm [shape: f32[8,64], index: 2, kind: output, shape index: {}]  }
   0x1   :  { %8 = vsyncpa [#allocation6], 0 }
   0x2   :  { %9 = vsyncpa [#allocation4], 0  ;;  %s15_s11 = sshll.u32 %s179_s0, 4  ;;  %s151_s12 = smov [#allocation2]   ;;  %s16_s11 = int_to_ptr.hbm [resolvable:$true] %s15_s11 }
   0x3   :  { %s17_s13 = sshll.u32 %s151_s12, 4  ;;  %s26_s16 = sshll.u32 %s180_s1, 4  ;;  %s18_s13 = int_to_ptr.vmem [resolvable:$true] %s17_s13  ;;  %s27_s16 = int_to_ptr.hbm [resolvable:$true] %s26_s16 }
   0x4   :  { %20 = dma.hbm_to_vmem [thread:$0]  %s16_s11, 128, %s18_s13, [#allocation3]  }
   0x5   :  { %s152_s17 = smov [#allocation5]  }
   0x6   :  { %s28_s18 = sshll.u32 %s152_s17, 4  ;;  %s29_s18 = int_to_ptr.vmem [resolvable:$true] %s28_s18 }
   0x7   :  { %31 = dma.hbm_to_vmem [thread:$0]  %s27_s16, 128, %s29_s18, [#allocation6]  }
   0x8   :  { %145 = dma.done.wait [#allocation3], 128  }
   0x9   :  { %146 = vsyncadd [#allocation3], 4294967168 }
   0xa   :  { %147 = dma.done.wait [#allocation6], 128  }
   0xb   :  { %148 = vsyncadd [#allocation6], 4294967168  ;;  %v41_v0 = vld [vmem:[#allocation5] sm:$0xff]  ;;  %s153_s0 = smov 32   ;;  %vm46_vm0 = vcmask 261120   ;;  %v40_v1 = vld [vmem:[#allocation2] sm:$0xff] }
   0xc   :  { %43 = vrot.lane.b32.xlu0 %v41_v0, %s153_s0  ;;  %s154_s19 = smov [#allocation7]   ;;  %s58_s1 = sshll.u32 %s181_s2, 4  ;;  %vm49_vm1 = vcmask 523264   ;;  %s59_s1 = int_to_ptr.hbm [resolvable:$true] %s58_s1 }
   0xd   :  { %s56_s20 = sshll.u32 %s154_s19, 4  ;;  %s57_s20 = int_to_ptr.vmem [resolvable:$true] %s56_s20 }
  0x7e   :  { %v44_v2 = vpop.permute.xlu0 %43 }
  0x7f   :  { %v47_v3 = vsel %vm46_vm0, %v41_v0, %v44_v2 }
  0x80   :  { %v48_v4 = vadd.f32 %v47_v3, %v40_v1 }
  0x82   :  { %50 = vst.msk [vmem:[#allocation7] sm:$0xff] %vm49_vm1, %v48_v4 }
  0x83   :  { %61 = dma.vmem_to_hbm [thread:$0]  %s57_s20, 128, %s59_s1, [#allocation4]  }
  0x84   :  { %149 = dma.done.wait [#allocation4], 128  }
  0x85   :  { %150 = vsyncadd [#allocation4], 4294967168 }
  0x86   :  { %66 = vsyncpa [#allocation3], 1 }
  0x87   :  { %67 = vsyncpa [#allocation6], 1 }
  0x88   :  { %68 = vsyncpa [#allocation4], 1 }

</bundles_post_ra>
